<compile_context>
chip_gen: v7x
topology: tpu7x:2x2x1
jax: 0.10.0
libtpu: 0.0.40
codegen_flags: <defaults>
</compile_context>

<pallas_src>
import functools
import math

import jax
import jax.numpy as jnp
from jax.experimental import pallas as pl
from jax.experimental.pallas import tpu as pltpu

LANES = 128
SUBLANES = 8
NUM_PARALLEL = 2  # leading "parallel" grid axis -> 2 TensorCores on v7x


def _wing_loss_kernel(x_ref, t_ref, out_ref, *, w, inv_e, C, rows, tile_rows,
                      nbc, needs_mask):
    c = pl.program_id(0)   # parallel slot (TensorCore on v7x)
    j = pl.program_id(1)   # reduction axis (arbitrary, last)

    @pl.when(j == 0)
    def _():
        out_ref[...] = jnp.zeros_like(out_ref)

    x = x_ref[...].astype(jnp.float32)
    t = t_ref[...].astype(jnp.float32)

    weight = jnp.where(t == -1.0, 0.0, 1.0)
    diff = weight * (x - t)
    abs_diff = jnp.abs(diff)

    y = jnp.where(abs_diff < w,
                  w * jnp.log1p(abs_diff * inv_e),
                  abs_diff - C)

    if needs_mask:
        # Zero out rows belonging to duplicated / partially-OOB trailing blocks.
        row_start = (c * nbc + j) * tile_rows
        row_idx = row_start + jax.lax.broadcasted_iota(
            jnp.int32, (tile_rows, LANES), 0)
        y = jnp.where(row_idx < rows, y, 0.0)

    # Pure-VPU partial sums: collapse the tile onto one (8,128) vreg block.
    out_ref[...] += y.reshape(tile_rows // SUBLANES, SUBLANES, LANES).sum(axis=0)


def wing_loss(x, t, *, w=10.0, e=2.0, tile_rows=1024):
    """WingLoss(w, e).forward(x, t) -> scalar sum (matches the PyTorch module)."""
    assert x.shape == t.shape
    C = w - w * math.log(1.0 + w / e)

    n = x.size
    x_f = x.reshape(-1)
    t_f = t.reshape(-1)

    chunk = SUBLANES * LANES  # 1024
    if n % chunk:
        # TODO(synk): handle the ragged tail fully in-kernel (1-D layout) instead
        # of padding; zero padding contributes exactly 0 to WingLoss, so
        # correctness is unaffected, it just costs one extra copy when hit.
        pad = chunk - n % chunk
        x_f = jnp.pad(x_f, (0, pad))
        t_f = jnp.pad(t_f, (0, pad))

    rows = x_f.size // LANES           # multiple of 8
    x2 = x_f.reshape(rows, LANES)
    t2 = t_f.reshape(rows, LANES)

    # Effective tile: big (default 1024 rows), multiple of 8, never above rows.
    tile_rows = max(SUBLANES, (min(tile_rows, rows) // SUBLANES) * SUBLANES)
    nb = pl.cdiv(rows, tile_rows)            # total row blocks
    nbc = pl.cdiv(nb, NUM_PARALLEL)          # row blocks per parallel slot
    needs_mask = (NUM_PARALLEL * nbc * tile_rows) != rows

    def in_map(c, j):
        # Clamp so duplicated trailing blocks never DMA out of bounds; the
        # in-kernel row mask zeroes their contribution.
        return (jnp.minimum(c * nbc + j, nb - 1), 0)

    blk = pl.BlockSpec((tile_rows, LANES), in_map)

    kernel = functools.partial(
        _wing_loss_kernel,
        w=float(w),
        inv_e=float(1.0 / e),
        C=float(C),
        rows=rows,
        tile_rows=tile_rows,
        nbc=nbc,
        needs_mask=needs_mask,
    )

    partials = pl.pallas_call(
        kernel,
        out_shape=jax.ShapeDtypeStruct((NUM_PARALLEL * SUBLANES, LANES),
                                       jnp.float32),
        grid_spec=pltpu.PrefetchScalarGridSpec(
            num_scalar_prefetch=0,
            grid=(NUM_PARALLEL, nbc),
            in_specs=[blk, blk],
            out_specs=pl.BlockSpec((SUBLANES, LANES), lambda c, j: (c, 0)),
        ),
        compiler_params=pltpu.CompilerParams(
            dimension_semantics=("parallel", "arbitrary"),
        ),
    )(x2, t2)

    # Tiny final reduce (2*8*128 elements) in plain JAX.
    return jnp.sum(partials)


def _reference(x, t, w=10.0, e=2.0):
    C = w - w * math.log(1.0 + w / e)
    xf = x.astype(jnp.float32)
    tf = t.astype(jnp.float32)
    weight = jnp.where(tf == -1.0, 0.0, 1.0)
    diff = weight * (xf - tf)
    ad = jnp.abs(diff)
    flag = (ad < w).astype(jnp.float32)
    y = flag * w * jnp.log(1.0 + ad / e) + (1.0 - flag) * (ad - C)
    return jnp.sum(y)


if __name__ == "__main__":
    key = jax.random.PRNGKey(0)
    k1, k2, k3 = jax.random.split(key, 3)
    shape = (2, 4, 16, 16)  # NCHW-style landmark/regression tensor
    x = jax.random.normal(k1, shape, dtype=jnp.float32)
    t = jax.random.normal(k2, shape, dtype=jnp.float32) * 2.0
    # Sprinkle in ignored targets (t == -1) to exercise the weight path.
    t = jnp.where(jax.random.uniform(k3, shape) < 0.15, -1.0, t)

    out = wing_loss(x, t)
    out = jax.block_until_ready(out)

    ref = _reference(x, t)
    assert jnp.allclose(out, ref, rtol=1e-4, atol=1e-3), (out, ref)
    print("KERNEL_OK")
</pallas_src>

<mosaic_0001>
module attributes {stable_mosaic.version = 11 : i64} {
  func.func @_wing_loss_kernel(%arg0: i32, %arg1: i32, %arg2: memref<16x128xf32, #tpu.memory_space<vmem>>, %arg3: memref<16x128xf32, #tpu.memory_space<vmem>>, %arg4: memref<8x128xf32, #tpu.memory_space<vmem>>) attributes {dimension_semantics = [#tpu.dimension_semantics<parallel>, #tpu.dimension_semantics<arbitrary>], iteration_bounds = array<i64: 2, 1>, scalar_prefetch = 0 : i64, scratch_operands = 0 : i64, tpu.core_type = #tpu.core_type<tc>, window_params = [{transform_indices = @transform_0, window_bounds = array<i64: 16, 128>}, {transform_indices = @transform_1, window_bounds = array<i64: 16, 128>}, {transform_indices = @transform_2, window_bounds = array<i64: 8, 128>}]} {
    %c0_i32 = arith.constant 0 : i32
    %0 = arith.cmpi eq, %arg1, %c0_i32 : i32
    %1 = arith.extui %0 : i1 to i32
    %c0_i32_0 = arith.constant 0 : i32
    %2 = arith.cmpi ne, %1, %c0_i32_0 : i32
    scf.if %2 {
      %cst_17 = arith.constant 0.000000e+00 : f32
      %38 = vector.broadcast %cst_17 : f32 to vector<8x128xf32>
      %c0_18 = arith.constant 0 : index
      %c0_19 = arith.constant 0 : index
      %39 = vector.load %arg4[%c0_18, %c0_19] : memref<8x128xf32, #tpu.memory_space<vmem>>, vector<8x128xf32>
      tpu.vector_store %arg4[%c0_18, %c0_19], %38 {strides = array<i32>} : memref<8x128xf32, #tpu.memory_space<vmem>>, vector<8x128xf32>,
    } else {
    }
    %c0 = arith.constant 0 : index
    %c0_1 = arith.constant 0 : index
    %3 = vector.load %arg2[%c0, %c0_1] : memref<16x128xf32, #tpu.memory_space<vmem>>, vector<16x128xf32>
    %c0_2 = arith.constant 0 : index
    %c0_3 = arith.constant 0 : index
    %4 = vector.load %arg3[%c0_2, %c0_3] : memref<16x128xf32, #tpu.memory_space<vmem>>, vector<16x128xf32>
    %cst = arith.constant -1.000000e+00 : f32
    %5 = vector.broadcast %cst : f32 to vector<16x128xf32>
    %6 = arith.cmpf oeq, %4, %5 : vector<16x128xf32>
    %cst_4 = arith.constant 0.000000e+00 : f32
    %cst_5 = arith.constant 1.000000e+00 : f32
    %7 = vector.broadcast %cst_4 : f32 to vector<16x128xf32>
    %8 = vector.broadcast %cst_5 : f32 to vector<16x128xf32>
    %9 = arith.select %6, %7, %8 : vector<16x128xi1>, vector<16x128xf32>
    %10 = arith.subf %3, %4 : vector<16x128xf32>
    %11 = arith.mulf %9, %10 : vector<16x128xf32>
    %12 = math.absf %11 : vector<16x128xf32>
    %cst_6 = arith.constant 1.000000e+01 : f32
    %13 = vector.broadcast %cst_6 : f32 to vector<16x128xf32>
    %14 = arith.cmpf olt, %12, %13 : vector<16x128xf32>
    %cst_7 = arith.constant 5.000000e-01 : f32
    %15 = vector.broadcast %cst_7 : f32 to vector<16x128xf32>
    %16 = arith.mulf %12, %15 : vector<16x128xf32>
    %17 = math.log1p %16 : vector<16x128xf32>
    %cst_8 = arith.constant 1.000000e+01 : f32
    %18 = vector.broadcast %cst_8 : f32 to vector<16x128xf32>
    %19 = arith.mulf %18, %17 : vector<16x128xf32>
    %cst_9 = arith.constant -7.9175949 : f32
    %20 = vector.broadcast %cst_9 : f32 to vector<16x128xf32>
    %21 = arith.subf %12, %20 : vector<16x128xf32>
    %22 = arith.select %14, %19, %21 : vector<16x128xi1>, vector<16x128xf32>
    %c1_i32 = arith.constant 1 : i32
    %23 = arith.muli %arg0, %c1_i32 : i32
    %24 = arith.addi %23, %arg1 : i32
    %c16_i32 = arith.constant 16 : i32
    %25 = arith.muli %24, %c16_i32 : i32
    %26 = tpu.iota {dimensions = array<i32: 0>} : vector<16x128xi32>
    %27 = vector.broadcast %25 : i32 to vector<16x128xi32>
    %28 = arith.addi %27, %26 : vector<16x128xi32>
    %c16_i32_10 = arith.constant 16 : i32
    %29 = vector.broadcast %c16_i32_10 : i32 to vector<16x128xi32>
    %30 = arith.cmpi slt, %28, %29 : vector<16x128xi32>
    %cst_11 = arith.constant 0.000000e+00 : f32
    %31 = vector.broadcast %cst_11 : f32 to vector<16x128xf32>
    %32 = arith.select %30, %22, %31 : vector<16x128xi1>, vector<16x128xf32>
    %c0_12 = arith.constant 0 : index
    %c0_13 = arith.constant 0 : index
    %33 = vector.load %arg4[%c0_12, %c0_13] : memref<8x128xf32, #tpu.memory_space<vmem>>, vector<8x128xf32>
    %34 = vector.shape_cast %32 : vector<16x128xf32> to vector<2x8x128xf32>
    %cst_14 = arith.constant dense<0.000000e+00> : vector<8x128xf32>
    %35 = vector.multi_reduction <add>, %34, %cst_14 [0] : vector<2x8x128xf32> to vector<8x128xf32>
    %36 = arith.addf %33, %35 : vector<8x128xf32>
    %c0_15 = arith.constant 0 : index
    %c0_16 = arith.constant 0 : index
    %37 = vector.load %arg4[%c0_15, %c0_16] : memref<8x128xf32, #tpu.memory_space<vmem>>, vector<8x128xf32>
    tpu.vector_store %arg4[%c0_15, %c0_16], %36 {strides = array<i32>} : memref<8x128xf32, #tpu.memory_space<vmem>>, vector<8x128xf32>,
    return
  }
  func.func @transform_0(%arg0: i32, %arg1: i32) -> (i32, i32) {
    %c1_i32 = arith.constant 1 : i32
    %0 = arith.muli %arg0, %c1_i32 : i32
    %1 = arith.addi %0, %arg1 : i32
    %c0_i32 = arith.constant 0 : i32
    %2 = arith.minsi %1, %c0_i32 : i32
    %c0_i32_0 = arith.constant 0 : i32
    %c0_i32_1 = arith.constant 0 : i32
    return %2, %c0_i32_0 : i32, i32
  }
  func.func @transform_1(%arg0: i32, %arg1: i32) -> (i32, i32) {
    %c1_i32 = arith.constant 1 : i32
    %0 = arith.muli %arg0, %c1_i32 : i32
    %1 = arith.addi %0, %arg1 : i32
    %c0_i32 = arith.constant 0 : i32
    %2 = arith.minsi %1, %c0_i32 : i32
    %c0_i32_0 = arith.constant 0 : i32
    %c0_i32_1 = arith.constant 0 : i32
    return %2, %c0_i32_0 : i32, i32
  }
  func.func @transform_2(%arg0: i32, %arg1: i32) -> (i32, i32) {
    %c0_i32 = arith.constant 0 : i32
    %c0_i32_0 = arith.constant 0 : i32
    return %arg0, %c0_i32 : i32, i32
  }
}

</mosaic_0001>

<bundles_post_ra>
// kernel: tpu_custom_call.1
= control target key start
LH: loop header
LB: loop body
LE: loop exit
PB: predicated region body
PF: predicated region fallthrough
CT: control target
= control target key end

     0   :  { %7 = vsyncpa [#allocation3], 0  ;;  %s938_s0 = inlined_call_operand.hbm [shape: f32[16,128], index: 0, kind: input, shape index: {}]   ;;  %s939_s1 = inlined_call_operand.hbm [shape: f32[16,128], index: 1, kind: input, shape index: {}]   ;;  %s940_s2 = inlined_call_operand.hbm [shape: f32[16,128], index: 2, kind: output, shape index: {}]  }
   0x1   :  { %9 = vsyncpa [#allocation3 + $0x1], 0 }
   0x2   :  { %10 = vsyncpa [#allocation6], 0 }
   0x3   :  { %12 = vsyncpa [#allocation6 + $0x1], 0 }
   0x4   :  { %13 = vsyncpa [#allocation4], 0 }
   0x5   :  { %15 = vsyncpa [#allocation4 + $0x1], 0  ;;  %s730_s9 = smov 0   ;;  %s732_s10 = smov 0  }
   0x6   :  { %s734_s11 = smov 0   ;;  %s736_s12 = smov 0  }
   0x7   :  { %s738_s13 = smov 0   ;;  %s740_s14 = smov 0  }
   0x8   :  { %s742_s15 = smov 0   ;;  %s744_s16 = smov 0  }
   0x9 LB: > { %s418_s17 = sadd.s32 4294967295, %s707_s16   ;;  %s419_s18 = sadd.s32 4294967294, %s707_s16   ;;  %s707_s16 = sphi %s744_s16, %s21_s16   ;;  %s703_s15 = sphi %s742_s15, %s959_s15   ;;  %s699_s14 = sphi %s740_s14, %s958_s14   ;;  %s695_s13 = sphi %s738_s13, %s928_s13   ;;  %s691_s12 = sphi %s736_s12, %s957_s12   ;;  %s687_s11 = sphi %s734_s11, %s956_s11   ;;  %s683_s10 = sphi %s732_s10, %s955_s10   ;;  %s679_s9 = sphi %s730_s9, %s954_s9  }
   0xa   : > { %s33_s19 = sadd.s32 1, %s703_s15  ;;  %p676_p1 = scmp.ne.s32.totalorder %s695_s13, 0 }
   0xb   : > { %p35_p0 = scmp.ge.s32.totalorder %s33_s19, 2  ;;  %p54_p2 = scmp.eq.s32.totalorder %s707_s16, 0 }
   0xc   : > { %p59_p3 = scmp.ne.s32.totalorder %s695_s13, %s691_s12  ;;  %p60_p5 = scmp.eq.s32.totalorder %s418_s17, 0 }
   0xd   : > { %s961_s19 = smov (%p35_p0, %s33_s19), 0  ;;  %p776_p4 = por %p676_p1, %p54_p2 }
   0xe   : > { %p780_p6 = por %p60_p5, %p59_p3  ;;  %s101_s22 = ssub.s32 %s703_s15, %s961_s19 }
   0xf   : > { %p102_p7 = scmp.eq.s32.totalorder %s101_s22, 0  ;;  %s104_s23 = sadd.s32 1, %s687_s11 }
  0x10   : > { %s944_s21 = scalar_select %p780_p6, 1, 0 }
  0x11   : > { %s788_s24 = scalar_select %p102_p7, %s687_s11, %s104_s23  }
  0x12   : > { %p114_p8 = scmp.ne.s32.totalorder %s687_s11, %s683_s10  ;;  %p115_p9 = scmp.eq.s32.totalorder %s418_s17, 1 }
  0x13   : > { %p120_p10 = scmp.ne.s32.totalorder %s683_s10, %s679_s9  ;;  %p121_p11 = scmp.eq.s32.totalorder %s419_s18, 1 }
  0x14   : > { %p794_p12 = por %p115_p9, %p114_p8  ;;  %p458_p1 = scmp.lt.s32.totalorder %s707_s16, 2 }
  0x15   : > { %p799_p0 = por %p121_p11, %p120_p10  ;;  %s709_s27 = smov [#allocation2]  }
  0x16   : > { %s945_s25 = scalar_select %p794_p12, 1, 0 }
  0x17   : > { %s946_s26 = scalar_select %p799_p0, 1, 0 }
  0x18   : > { %s155_s28 = sshll.u32 %s709_s27, 4  ;;  %p806_p2 = pnand %p458_p1, %p776_p4  ;;  %s156_s28 = int_to_ptr.vmem [resolvable:$true] %s155_s28 }
  0x19   : > { %s540_s4 = scalar_lea.hbm %s938_s0, 256 }
  0x1a   : > { %p541_p3 = scmp.ne.s32.totalorder %s938_s0, %s540_s4  ;;  %p542_p5 = pneg %p806_p2 }
  0x1b   : > { %p547_p8 = scmp.lt.u32.totalorder %s540_s4, %s540_s4  ;;  %p549_p9 = scmp.lt.u32.totalorder %s540_s4, %s938_s0 }
  0x1c   : > { %p543_p7 = pnand %p542_p5, %p541_p3 }
  0x1d   : > { %p550_p10 = por %p549_p9, %p547_p8 }
  0x1e   : > { %p544_p4 = pneg %p543_p7 }
  0x20   : > { %p551_p11 = pnand %p550_p10, %p544_p4 }
  0x22   : > { %554 = shalt.err (!%p551_p11)
}
  0x23   : > { %s555_s12 = scalar_lea.vmem %s156_s28, 256  ;;  %s562_s17 = scalar_lea.vmem %s156_s28, 512 }
  0x24   : > { %p556_p1 = scmp.ne.s32.totalorder %s156_s28, %s555_s12  ;;  %p563_p12 = scmp.lt.s32.totalorder %s156_s28, %s156_s28 }
  0x25   : > { %p564_p6 = scmp.lt.s32.totalorder %s562_s17, %s555_s12 }
  0x26   : > { %p558_p13 = pnand %p556_p1, %p542_p5 }
  0x27   : > { %p565_p3 = por %p564_p6, %p563_p12 }
  0x28   : > { %p559_p0 = pneg %p558_p13 }
  0x2a   : > { %p566_p7 = pnand %p565_p3, %p559_p0 }
  0x2c   : > { %569 = shalt.err (!%p566_p7)
}
  0x2d   : > { %s710_s18 = smov 128   ;;  %s711_s20 = smov 8  }
  0x2e   : > { %450 = dma.hbm_to_vmem [thread:$0]  (!%p806_p2), %s938_s0, 256, %s156_s28, [#allocation3], %s710_s18, %s710_s18, %s711_s20  }
  0x2f   : > { %p428_p13 = scmp.ge.s32.totalorder %s707_s16, 1  ;;  %p187_p4 = scmp.lt.s32.totalorder %s707_s16, 3 }
  0x30   : > { %s712_s30 = smov [#allocation5]   ;;  %s570_s6 = scalar_lea.hbm %s939_s1, 256 }
  0x31   : > { %p837_p8 = pnand %p428_p13, %p187_p4  ;;  %s179_s3 = sshll.u32 %s712_s30, 4  ;;  %s180_s3 = int_to_ptr.vmem [resolvable:$true] %s179_s3 }
  0x32   : > { %p571_p6 = scmp.ne.s32.totalorder %s939_s1, %s570_s6  ;;  %p577_p9 = scmp.lt.u32.totalorder %s570_s6, %s570_s6 }
  0x33   : > { %s948_s27 = scalar_select %p837_p8, 1, 0 }
  0x34   : > { %p573_p12 = pnand %p571_p6, %p542_p5  ;;  %p579_p10 = scmp.lt.u32.totalorder %s570_s6, %s939_s1 }
  0x36   : > { %p574_p0 = pneg %p573_p12  ;;  %p580_p11 = por %p579_p10, %p577_p9 }
  0x38   : > { %p581_p1 = pnand %p580_p11, %p574_p0 }
  0x3a   : > { %584 = shalt.err (!%p581_p1)
}
  0x3b   : > { %s585_s17 = scalar_lea.vmem %s180_s3, 256  ;;  %s592_s22 = scalar_lea.vmem %s180_s3, 512 }
  0x3c   : > { %p586_p3 = scmp.ne.s32.totalorder %s180_s3, %s585_s17  ;;  %p593_p4 = scmp.lt.s32.totalorder %s180_s3, %s180_s3 }
  0x3d   : > { %p594_p8 = scmp.lt.s32.totalorder %s592_s22, %s585_s17 }
  0x3e   : > { %p588_p7 = pnand %p586_p3, %p542_p5 }
  0x3f   : > { %p595_p6 = por %p594_p8, %p593_p4 }
  0x40   : > { %p589_p13 = pneg %p588_p7 }
  0x42   : > { %p596_p12 = pnand %p595_p6, %p589_p13 }
  0x44   : > { %599 = shalt.err (!%p596_p12)
}
  0x45   : > { %453 = dma.hbm_to_vmem [thread:$0]  (!%p806_p2), %s939_s1, 256, %s180_s3, [#allocation6], %s710_s18, %s710_s18, %s711_s20  }
  0x46   : > { %p949_p0 = scmp.ne.s32.totalorder %s948_s27, 0 }
  0x47   : > { %s193_s4 = sand.u32 (!%p949_p0), 1, %s695_s13   ;;  %p950_p5 = scmp.ne.s32.totalorder (!%p949_p0), %s944_s21, 0 }
  0x48   : > { %191 = sbr.rel (%p949_p0) target bundleno = 129 (0x81), region = 28  ;;  %s429_s5 = sshll.u32 (!%p949_p0), %s193_s4, 4 }
  0x49   : > { %s194_s6 = scalar_lea.sflag (!%p949_p0), [#allocation3], %s193_s4  ;;  %s197_s7 = scalar_lea.vmem (!%p949_p0), [#allocation2], %s429_s5 }
  0x4f   : > { %665 = dma.done.wait (%p950_p5), %s194_s6, 256  }
  0x50   : > { %667 = vsyncadd (%p950_p5), %s194_s6, 4294967040  ;;  %s203_s29 = scalar_lea.sflag [#allocation6], %s193_s4  ;;  %s206_s8 = scalar_lea.vmem [#allocation5], %s429_s5 }
  0x51   : > { %669 = dma.done.wait (%p950_p5), %s203_s29, 256  }
  0x52   : > { %671 = vsyncadd (%p950_p5), %s203_s29, 4294967040  ;;  %v245_v0 = vld [vmem:[%s197_s7] sm:$0xff]  ;;  %v246_v1 = vld [vmem:[%s197_s7 + $0x8] sm:$0xff]  ;;  %v713_v5 = vmov 1.0   ;;  %v289_v17 = vlaneseq  ;;  %s434_s21 = sshll.u32 %s699_s14, 4  ;;  %s229_s18 = sand.u32 1, %s683_s10  }
  0x53   : > { %v247_v2 = vld [vmem:[%s206_s8] sm:$0xff]  ;;  %v248_v3 = vld [vmem:[%s206_s8 + $0x8] sm:$0xff]  ;;  %v292_v26 = vstv %s434_s21  ;;  %s431_s20 = sshll.u32 %s229_s18, 3  ;;  %s436_s27 = sshll.u32 %s699_s14, 7 }
  0x54   : > { %vm249_vm0 = vcmp.eq.f32.partialorder %v247_v2, -1.0  ;;  %v253_v4 = vsub.f32 %v245_v0, %v247_v2  ;;  %vm250_vm1 = vcmp.eq.f32.partialorder %v248_v3, -1.0  ;;  %v254_v7 = vsub.f32 %v246_v1, %v248_v3  ;;  %s231_s3 = scalar_lea.vmem [#allocation7], %s431_s20  ;;  %s883_s22 = scalar_lea.hbm %s940_s2, %s436_s27 }
  0x55   : > { %v251_v6 = vsel %vm249_vm0, 0.0, %v713_v5  ;;  %v252_v8 = vsel %vm250_vm1, 0.0, %v713_v5  ;;  %v290_v20 = vshrl.u32 %v289_v17, 7  ;;  %s317_s28 = sshll.u32 %s231_s3, 4  ;;  %s304_s23 = scalar_lea.sflag [#allocation4], %s229_s18  ;;  %s885_s28 = int_to_ptr.vmem [resolvable:$true] %s317_s28 }
  0x56   : > { %v255_v9 = vmul.f32 %v253_v4, %v251_v6  ;;  %v256_v10 = vmul.f32 %v254_v7, %v252_v8  ;;  %s600_s30 = scalar_lea.vmem %s885_s28, 128  ;;  %p951_p8 = scmp.ne.s32.totalorder %s945_s25, 0 }
  0x57   : > { %v291_v25 = vadd.s32 8, %v290_v20  ;;  %v293_v30 = vadd.s32 %v292_v26, %v290_v20  ;;  %p601_p2 = scmp.ne.s32.totalorder %s885_s28, %s600_s30  ;;  %s714_s14 = smov [#allocation7]  }
  0x58   : > { %v257_v11 = vand.u32 2147483647, %v255_v9  ;;  %v258_v12 = vand.u32 2147483647, %v256_v10  ;;  %s604_s4 = sshll.u32 %s714_s14, 4  ;;  %s605_s4 = int_to_ptr.vmem [resolvable:$false] %s604_s4 }
  0x59   : > { %v294_v33 = vadd.s32 %v292_v26, %v291_v25  ;;  %vm295_vm6 = vcmp.lt.s32.totalorder %v293_v30, 16  ;;  %p602_p9 = pnand %p601_p2, %p951_p8  ;;  %s606_s5 = scalar_lea.vmem %s605_s4, 256 }
  0x5a   : > { %v261_v13 = vmul.f32 0.5, %v257_v11  ;;  %v262_v14 = vmul.f32 0.5, %v258_v12  ;;  %v432_v35 = vadd.f32 7.917595, %v257_v11  ;;  %vm259_vm4 = vcmp.lt.f32.partialorder %v257_v11, 10.0  ;;  %p607_p11 = scmp.lt.s32.totalorder %s885_s28, %s605_s4  ;;  %p608_p1 = scmp.lt.s32.totalorder %s606_s5, %s600_s30 }
  0x5b   : > { %v433_v37 = vadd.f32 7.917595, %v258_v12  ;;  %vm260_vm5 = vcmp.lt.f32.partialorder %v258_v12, 10.0  ;;  %vm296_vm7 = vcmp.lt.s32.totalorder %v294_v33, 16  ;;  %p603_p10 = pneg %p602_p9 }
  0x5c   : > { %v263_v15 = vadd.f32 1.0, %v261_v13  ;;  %v272_v16 = vadd.f32 1.0, %v262_v14  ;;  %v266_v18 = vmul.f32 -0.5, %v261_v13  ;;  %v275_v19 = vmul.f32 -0.5, %v262_v14  ;;  %p609_p3 = por %p608_p1, %p607_p11 }
  0x5d   : > { %v269_v22 = vand.u32 2147483647, %v261_v13  ;;  %v278_v24 = vand.u32 2147483647, %v262_v14 }
  0x5e   : > { %536 = vlog2.f32 %v263_v15  ;;  %v267_v21 = vadd.f32 1.0, %v266_v18  ;;  %v276_v23 = vadd.f32 1.0, %v275_v19  ;;  %p610_p7 = pnand %p609_p3, %p603_p10 }
  0x5f   : > { %538 = vlog2.f32 %v272_v16  ;;  %vm270_vm2 = vcmp.lt.f32.partialorder %v269_v22, 0.0004427343  ;;  %vm279_vm3 = vcmp.lt.f32.partialorder %v278_v24, 0.0004427343 }
  0x60   : > { %v268_v27 = vmul.f32 %v267_v21, %v261_v13  ;;  %v277_v29 = vmul.f32 %v276_v23, %v262_v14 }
  0x68   : > { %v537_v28 = vpop.eup %536 }
  0x69   : > { %v539_v31 = vpop.eup %538  ;;  %v265_v32 = vmul.f32 0.6931472, %v537_v28 }
  0x6a   : > { %v274_v34 = vmul.f32 0.6931472, %v539_v31 }
  0x6b   : > { %v271_v36 = vsel %vm270_vm2, %v268_v27, %v265_v32 }
  0x6c   : > { %v280_v38 = vsel %vm279_vm3, %v277_v29, %v274_v34  ;;  %v281_v39 = vmul.f32 10.0, %v271_v36 }
  0x6d   : > { %v282_v40 = vmul.f32 10.0, %v280_v38 }
  0x6e   : > { %v285_v41 = vsel %vm259_vm4, %v281_v39, %v432_v35 }
  0x6f   : > { %v286_v42 = vsel %vm260_vm5, %v282_v40, %v433_v37  ;;  %v297_v43 = vsel %vm295_vm6, %v285_v41, 0.0 }
  0x70   : > { %v298_v44 = vsel %vm296_vm7, %v286_v42, 0.0 }
  0x71   : > { %v300_v45 = vadd.f32 %v298_v44, %v297_v43 }
  0x73   : > { %302 = vst [vmem:[%s231_s3] sm:$0xff] %v300_v45 }
  0x74   : > { %613 = shalt.err (!%p610_p7)
}
  0x75   : > { %s614_s6 = scalar_lea.hbm %s883_s22, 128  ;;  %s618_s8 = scalar_lea.hbm %s940_s2, 256 }
  0x76   : > { %p615_p13 = scmp.ne.s32.totalorder %s883_s22, %s614_s6  ;;  %p619_p12 = scmp.lt.u32.totalorder %s883_s22, %s940_s2 }
  0x77   : > { %p620_p0 = scmp.lt.u32.totalorder %s618_s8, %s614_s6  ;;  %p622_p2 = scmp.lt.u32.totalorder %s614_s6, %s883_s22 }
  0x78   : > { %p616_p4 = pnand %p615_p13, %p951_p8 }
  0x79   : > { %p621_p5 = por %p620_p0, %p619_p12 }
  0x7a   : > { %p617_p6 = pneg %p616_p4 }
  0x7b   : > { %p623_p9 = por %p622_p2, %p621_p5 }
  0x7d   : > { %p624_p10 = pnand %p623_p9, %p617_p6 }
  0x7f   : > { %627 = shalt.err (!%p624_p10)
}
  0x80   : > { %445 = dma.vmem_to_hbm [thread:$0]  (%p951_p8), %s885_s28, 128, %s883_s22, %s304_s23  }
  0x81 PF: > { %s329_s20 = sand.u32 1, %s679_s9   ;;  %p952_p11 = scmp.ne.s32.totalorder %s946_s26, 0 }
  0x82   : > { %p953_p1 = scmp.ge.s32.totalorder %s707_s16, 2  ;;  %s330_s27 = scalar_lea.sflag [#allocation4], %s329_s20 }
  0x84   : > { %p455_p3 = pnand %p953_p1, %p952_p11 }
  0x86   : > { %673 = dma.done.wait (!%p455_p3), %s330_s27, 128  }
  0x87   : > { %675 = vsyncadd (!%p455_p3), %s330_s27, 4294967168  ;;  %s21_s16 = sadd.s32 1, %s707_s16   ;;  %s954_s9 = smov %s683_s10 }
  0x88   : > { %p18_p7 = scmp.ge.s32.totalorder %s21_s16, 4   ;;  %s955_s10 = smov %s687_s11 }
  0x89   : > { %s956_s11 = smov %s788_s24  ;;  %s957_s12 = smov %s695_s13 }
  0x8a   : > { %s928_s13 = smov 0   ;;  %s958_s14 = smov %s703_s15 }
  0x8b   : > { %s959_s15 = smov %s961_s19  ;;  %20 = sbr.rel (!%p18_p7) target bundleno = 9 (0x9), region = 90 }
  0x92   :  { %335 = vsyncpa [#allocation3], 1 }
  0x93   :  { %337 = vsyncpa [#allocation3 + $0x1], 1 }
  0x94   :  { %338 = vsyncpa [#allocation6], 1 }
  0x95   :  { %340 = vsyncpa [#allocation6 + $0x1], 1 }
  0x96   :  { %341 = vsyncpa [#allocation4], 1 }
  0x97   :  { %343 = vsyncpa [#allocation4 + $0x1], 1 }

</bundles_post_ra>
